<compile_context>
chip_gen: v5e
topology: v5e:2x2
jax: 0.10.0
libtpu: 0.0.40
codegen_flags: <defaults>
</compile_context>

<pallas_src>
import jax
import jax.numpy as jnp
import numpy as np
from jax.experimental import pallas as pl
from jax.experimental.pallas import tpu as pltpu


def _choose_hw_tile(hw, c, itemsize, target_bytes=2 * 1024 * 1024):
    """Largest multiple-of-128 divisor of `hw` whose (c x tile) block is <= ~target_bytes."""
    if hw % 128 != 0:
        # Mosaic needs the last block dim to be a multiple of 128 or the full extent.
        return hw
    cap = max(128, (target_bytes // max(1, c * itemsize)) // 128 * 128)
    m = hw // 128
    best = 128
    d = 1
    while d * d <= m:
        if m % d == 0:
            for q in (d, m // d):
                t = q * 128
                if best < t <= cap:
                    best = t
        d += 1
    return best


def _make_kernel(inv_hw):
    def channel_attention_kernel(x_ref, w1_ref, w2_ref, o_ref, sum_ref, max_ref):
        # x_ref:  (1, C, tHW)  one image tile: channels on sublanes, spatial on lanes
        # w1_ref: (Cmid, C)    fc1 weight (native PyTorch layout, no bias)
        # w2_ref: (C, Cmid)    fc2 weight (native PyTorch layout, no bias)
        # o_ref:  (1, C, 1)    sigmoid(fc2(relu(fc1(avg))) + fc2(relu(fc1(max))))
        # sum_ref/max_ref: (C, 1) f32 running accumulators (VMEM scratch)
        t = pl.program_id(1)
        nt = pl.num_programs(1)

        x = x_ref[0]  # (C, tHW), native dtype

        # Partial pools over the spatial (lane) axis — XLU reductions.
        part_sum = jnp.sum(x.astype(jnp.float32), axis=1, keepdims=True)   # (C, 1) f32
        part_max = jnp.max(x, axis=1, keepdims=True).astype(jnp.float32)   # (C, 1) f32

        @pl.when(t == 0)
        def _():
            sum_ref[...] = jnp.zeros_like(sum_ref)
            max_ref[...] = jnp.full_like(max_ref, -jnp.inf)

        sum_ref[...] += part_sum
        max_ref[...] = jnp.maximum(max_ref[...], part_max)

        @pl.when(t == nt - 1)
        def _():
            avg = sum_ref[...] * inv_hw        # (C, 1) global mean
            mx = max_ref[...]                  # (C, 1) global max

            w1 = w1_ref[...].astype(jnp.float32)   # (Cmid, C)
            w2 = w2_ref[...].astype(jnp.float32)   # (C, Cmid)

            # Shared MLP in transposed form; fc2 is linear so the two branches merge
            # after ReLU:  fc2(relu(fc1(avg))) + fc2(relu(fc1(max))) = w2 @ (ha + hm).
            ha = jnp.maximum(jnp.dot(w1, avg, preferred_element_type=jnp.float32), 0.0)
            hm = jnp.maximum(jnp.dot(w1, mx, preferred_element_type=jnp.float32), 0.0)
            y = jnp.dot(w2, ha + hm, preferred_element_type=jnp.float32)   # (C, 1)

            o_ref[0] = jax.nn.sigmoid(y).astype(o_ref.dtype)

    return channel_attention_kernel


def channel_attention_forward(x_nchw, w1, w2, hw_tile=None):
    """x_nchw: (N, C, H, W) (any float dtype, read in native layout/dtype).
    w1: (Cmid, C) = fc1.weight[:, :, 0, 0]  (PyTorch Conv2d 1x1, no bias)
    w2: (C, Cmid) = fc2.weight[:, :, 0, 0]
    Returns (N, C, 1, 1), matching the PyTorch module output layout."""
    N, C, H, W = x_nchw.shape
    Cmid = w1.shape[0]
    HW = H * W

    # Free reshape (no HBM transpose, no upcast): channels on sublanes, spatial on lanes.
    x = x_nchw.reshape(N, C, HW)

    if hw_tile is None:
        hw_tile = _choose_hw_tile(HW, C, x.dtype.itemsize)
    assert HW % hw_tile == 0, "hw_tile must evenly divide H*W"
    n_t = HW // hw_tile

    block_bytes = C * hw_tile * x.dtype.itemsize
    # Sized for the pipelined x blocks + weights/scratch headroom; well under v7x's 64 MiB.
    vmem_limit = int(min(48 * 1024 * 1024,
                         max(8 * 1024 * 1024, 4 * block_bytes + 2 * 1024 * 1024)))

    x_spec_kwargs = {}
    if n_t > 1:
        # Deeper input pipelining: nothing to hide DMA latency behind (2 VALU ops/vreg).
        x_spec_kwargs["pipeline_mode"] = pl.Buffered(3)

    kernel = _make_kernel(1.0 / HW)

    out = pl.pallas_call(
        kernel,
        out_shape=jax.ShapeDtypeStruct((N, C, 1), x_nchw.dtype),
        grid_spec=pltpu.PrefetchScalarGridSpec(
            num_scalar_prefetch=0,
            grid=(N, n_t),
            in_specs=[
                pl.BlockSpec((1, C, hw_tile), lambda n, t: (n, 0, t), **x_spec_kwargs),
                pl.BlockSpec((Cmid, C), lambda n, t: (0, 0)),
                pl.BlockSpec((C, Cmid), lambda n, t: (0, 0)),
            ],
            out_specs=pl.BlockSpec((1, C, 1), lambda n, t: (n, 0, 0)),
            scratch_shapes=[
                pltpu.VMEM((C, 1), jnp.float32),   # running sum
                pltpu.VMEM((C, 1), jnp.float32),   # running max
            ],
        ),
        compiler_params=pltpu.CompilerParams(
            dimension_semantics=("parallel", "arbitrary"),
            vmem_limit_bytes=vmem_limit,
        ),
    )(x, w1, w2)

    return out.reshape(N, C, 1, 1)


def reference_forward(x_nchw, w1, w2):
    """Pure-JAX reference of the PyTorch ChannelAttention forward."""
    avg = jnp.mean(x_nchw, axis=(2, 3))      # (N, C)
    mx = jnp.max(x_nchw, axis=(2, 3))        # (N, C)

    def mlp(v):
        h = jnp.maximum(v @ w1.T, 0.0)       # fc1 + ReLU
        return h @ w2.T                      # fc2

    out = jax.nn.sigmoid(mlp(avg) + mlp(mx))
    return out.reshape(out.shape[0], out.shape[1], 1, 1)


if __name__ == "__main__":
    # Small shapes consistent with the module: in_planes=64 -> mid = 64 // 16 = 4.
    N, C, H, W = 2, 64, 16, 16
    Cmid = C // 16

    key = jax.random.PRNGKey(0)
    k = jax.random.split(key, 3)
    x = jax.random.normal(k[0], (N, C, H, W), jnp.float32)
    w1 = jax.random.normal(k[1], (Cmid, C), jnp.float32) * 0.1   # fc1 weight (1x1 conv, no bias)
    w2 = jax.random.normal(k[2], (C, Cmid), jnp.float32) * 0.1   # fc2 weight (1x1 conv, no bias)

    ref = reference_forward(x, w1, w2)

    # Default path (single HW tile for this small feature map).
    out = jax.block_until_ready(channel_attention_forward(x, w1, w2))
    np.testing.assert_allclose(np.asarray(out), np.asarray(ref), atol=1e-5, rtol=1e-5)

    # Also exercise the HW-tiled reduction (+ deeper pipelining) path.
    out_tiled = jax.block_until_ready(channel_attention_forward(x, w1, w2, hw_tile=128))
    np.testing.assert_allclose(np.asarray(out_tiled), np.asarray(ref), atol=1e-5, rtol=1e-5)

    print("KERNEL_OK")
</pallas_src>

<mosaic_0001>
module attributes {stable_mosaic.version = 11 : i64} {
  func.func @channel_attention_kernel(%arg0: i32, %arg1: i32, %arg2: memref<1x64x256xf32, #tpu.memory_space<vmem>>, %arg3: memref<4x64xf32, #tpu.memory_space<vmem>>, %arg4: memref<64x4xf32, #tpu.memory_space<vmem>>, %arg5: memref<1x64x1xf32, #tpu.memory_space<vmem>>, %arg6: memref<64x1xf32, #tpu.memory_space<vmem>>, %arg7: memref<64x1xf32, #tpu.memory_space<vmem>>) attributes {dimension_semantics = [#tpu.dimension_semantics<parallel>, #tpu.dimension_semantics<arbitrary>], iteration_bounds = array<i64: 2, 1>, scalar_prefetch = 0 : i64, scratch_operands = 2 : i64, tpu.core_type = #tpu.core_type<tc>, window_params = [{transform_indices = @transform_0, window_bounds = array<i64: 1, 64, 256>}, {pipeline_mode = #tpu.pipeline_mode<synchronous>, transform_indices = @transform_1, window_bounds = array<i64: 4, 64>}, {pipeline_mode = #tpu.pipeline_mode<synchronous>, transform_indices = @transform_2, window_bounds = array<i64: 64, 4>}, {transform_indices = @transform_3, window_bounds = array<i64: 1, 64, 1>}]} {
    %c0 = arith.constant 0 : index
    %c0_0 = arith.constant 0 : index
    %c0_1 = arith.constant 0 : index
    %0 = vector.load %arg2[%c0, %c0_0, %c0_1] : memref<1x64x256xf32, #tpu.memory_space<vmem>>, vector<1x64x256xf32>
    %1 = vector.shape_cast %0 : vector<1x64x256xf32> to vector<64x256xf32>
    %cst = arith.constant dense<0.000000e+00> : vector<64xf32>
    %2 = vector.multi_reduction <add>, %1, %cst [1] : vector<64x256xf32> to vector<64xf32>
    %3 = vector.shape_cast %2 : vector<64xf32> to vector<64x1xf32>
    %cst_2 = arith.constant dense<0xFF800000> : vector<64xf32>
    %4 = vector.multi_reduction <maximumf>, %1, %cst_2 [1] : vector<64x256xf32> to vector<64xf32>
    %5 = vector.shape_cast %4 : vector<64xf32> to vector<64x1xf32>
    %c0_i32 = arith.constant 0 : i32
    %6 = arith.cmpi eq, %arg1, %c0_i32 : i32
    %7 = arith.extui %6 : i1 to i32
    %c0_i32_3 = arith.constant 0 : i32
    %8 = arith.cmpi ne, %7, %c0_i32_3 : i32
    scf.if %8 {
      %cst_14 = arith.constant 0.000000e+00 : f32
      %18 = vector.broadcast %cst_14 : f32 to vector<64x1xf32>
      %c0_15 = arith.constant 0 : index
      %c0_16 = arith.constant 0 : index
      %19 = vector.load %arg6[%c0_15, %c0_16] : memref<64x1xf32, #tpu.memory_space<vmem>>, vector<64x1xf32>
      tpu.vector_store %arg6[%c0_15, %c0_16], %18 {strides = array<i32>} : memref<64x1xf32, #tpu.memory_space<vmem>>, vector<64x1xf32>,
      %cst_17 = arith.constant 0xFF800000 : f32
      %20 = vector.broadcast %cst_17 : f32 to vector<64x1xf32>
      %c0_18 = arith.constant 0 : index
      %c0_19 = arith.constant 0 : index
      %21 = vector.load %arg7[%c0_18, %c0_19] : memref<64x1xf32, #tpu.memory_space<vmem>>, vector<64x1xf32>
      tpu.vector_store %arg7[%c0_18, %c0_19], %20 {strides = array<i32>} : memref<64x1xf32, #tpu.memory_space<vmem>>, vector<64x1xf32>,
    } else {
    }
    %c0_4 = arith.constant 0 : index
    %c0_5 = arith.constant 0 : index
    %9 = vector.load %arg6[%c0_4, %c0_5] : memref<64x1xf32, #tpu.memory_space<vmem>>, vector<64x1xf32>
    %10 = arith.addf %9, %3 : vector<64x1xf32>
    %c0_6 = arith.constant 0 : index
    %c0_7 = arith.constant 0 : index
    %11 = vector.load %arg6[%c0_6, %c0_7] : memref<64x1xf32, #tpu.memory_space<vmem>>, vector<64x1xf32>
    tpu.vector_store %arg6[%c0_6, %c0_7], %10 {strides = array<i32>} : memref<64x1xf32, #tpu.memory_space<vmem>>, vector<64x1xf32>,
    %c0_8 = arith.constant 0 : index
    %c0_9 = arith.constant 0 : index
    %12 = vector.load %arg7[%c0_8, %c0_9] : memref<64x1xf32, #tpu.memory_space<vmem>>, vector<64x1xf32>
    %13 = arith.maximumf %12, %5 : vector<64x1xf32>
    %c0_10 = arith.constant 0 : index
    %c0_11 = arith.constant 0 : index
    %14 = vector.load %arg7[%c0_10, %c0_11] : memref<64x1xf32, #tpu.memory_space<vmem>>, vector<64x1xf32>
    tpu.vector_store %arg7[%c0_10, %c0_11], %13 {strides = array<i32>} : memref<64x1xf32, #tpu.memory_space<vmem>>, vector<64x1xf32>,
    %c0_i32_12 = arith.constant 0 : i32
    %15 = arith.cmpi eq, %arg1, %c0_i32_12 : i32
    %16 = arith.extui %15 : i1 to i32
    %c0_i32_13 = arith.constant 0 : i32
    %17 = arith.cmpi ne, %16, %c0_i32_13 : i32
    scf.if %17 {
      %c0_14 = arith.constant 0 : index
      %c0_15 = arith.constant 0 : index
      %18 = vector.load %arg6[%c0_14, %c0_15] : memref<64x1xf32, #tpu.memory_space<vmem>>, vector<64x1xf32>
      %cst_16 = arith.constant 3.906250e-03 : f32
      %19 = vector.broadcast %cst_16 : f32 to vector<64x1xf32>
      %20 = arith.mulf %18, %19 : vector<64x1xf32>
      %c0_17 = arith.constant 0 : index
      %c0_18 = arith.constant 0 : index
      %21 = vector.load %arg7[%c0_17, %c0_18] : memref<64x1xf32, #tpu.memory_space<vmem>>, vector<64x1xf32>
      %c0_19 = arith.constant 0 : index
      %c0_20 = arith.constant 0 : index
      %22 = vector.load %arg3[%c0_19, %c0_20] : memref<4x64xf32, #tpu.memory_space<vmem>>, vector<4x64xf32>
      %c0_21 = arith.constant 0 : index
      %c0_22 = arith.constant 0 : index
      %23 = vector.load %arg4[%c0_21, %c0_22] : memref<64x4xf32, #tpu.memory_space<vmem>>, vector<64x4xf32>
      %cst_23 = arith.constant dense<0.000000e+00> : vector<4x1xf32>
      %24 = tpu.matmul %22, %20, %cst_23 {dimension_numbers = #tpu.dot_dimension_numbers<[1], [0], [0], [1], [0, 0, 1, 1], [], []>} : vector<4x64xf32>, vector<64x1xf32>, vector<4x1xf32> -> vector<4x1xf32>
      %cst_24 = arith.constant 0.000000e+00 : f32
      %25 = vector.broadcast %cst_24 : f32 to vector<4x1xf32>
      %26 = arith.maximumf %24, %25 : vector<4x1xf32>
      %cst_25 = arith.constant dense<0.000000e+00> : vector<4x1xf32>
      %27 = tpu.matmul %22, %21, %cst_25 {dimension_numbers = #tpu.dot_dimension_numbers<[1], [0], [0], [1], [0, 0, 1, 1], [], []>} : vector<4x64xf32>, vector<64x1xf32>, vector<4x1xf32> -> vector<4x1xf32>
      %cst_26 = arith.constant 0.000000e+00 : f32
      %28 = vector.broadcast %cst_26 : f32 to vector<4x1xf32>
      %29 = arith.maximumf %27, %28 : vector<4x1xf32>
      %30 = arith.addf %26, %29 : vector<4x1xf32>
      %cst_27 = arith.constant dense<0.000000e+00> : vector<64x1xf32>
      %31 = tpu.matmul %23, %30, %cst_27 {dimension_numbers = #tpu.dot_dimension_numbers<[1], [0], [0], [1], [0, 0, 1, 1], [], []>} : vector<64x4xf32>, vector<4x1xf32>, vector<64x1xf32> -> vector<64x1xf32>
      %32 = arith.negf %31 : vector<64x1xf32>
      %33 = math.exp %32 : vector<64x1xf32>
      %cst_28 = arith.constant 1.000000e+00 : f32
      %34 = vector.broadcast %cst_28 : f32 to vector<64x1xf32>
      %35 = arith.addf %34, %33 : vector<64x1xf32>
      %36 = arith.divf %34, %35 : vector<64x1xf32>
      %c0_29 = arith.constant 0 : index
      %c0_30 = arith.constant 0 : index
      %c0_31 = arith.constant 0 : index
      %37 = vector.load %arg5[%c0_29, %c0_30, %c0_31] : memref<1x64x1xf32, #tpu.memory_space<vmem>>, vector<1x64x1xf32>
      %38 = vector.shape_cast %37 : vector<1x64x1xf32> to vector<64x1xf32>
      %39 = vector.shape_cast %36 : vector<64x1xf32> to vector<1x64x1xf32>
      tpu.vector_store %arg5[%c0_29, %c0_30, %c0_31], %39 {strides = array<i32>} : memref<1x64x1xf32, #tpu.memory_space<vmem>>, vector<1x64x1xf32>,
    } else {
    }
    return
  }
  func.func @transform_0(%arg0: i32, %arg1: i32) -> (i32, i32, i32) {
    %c0_i32 = arith.constant 0 : i32
    %c0_i32_0 = arith.constant 0 : i32
    return %arg0, %c0_i32, %arg1 : i32, i32, i32
  }
  func.func @transform_1(%arg0: i32, %arg1: i32) -> (i32, i32) {
    %c0_i32 = arith.constant 0 : i32
    %c0_i32_0 = arith.constant 0 : i32
    %c0_i32_1 = arith.constant 0 : i32
    return %c0_i32, %c0_i32_0 : i32, i32
  }
  func.func @transform_2(%arg0: i32, %arg1: i32) -> (i32, i32) {
    %c0_i32 = arith.constant 0 : i32
    %c0_i32_0 = arith.constant 0 : i32
    %c0_i32_1 = arith.constant 0 : i32
    return %c0_i32, %c0_i32_0 : i32, i32
  }
  func.func @transform_3(%arg0: i32, %arg1: i32) -> (i32, i32, i32) {
    %c0_i32 = arith.constant 0 : i32
    %c0_i32_0 = arith.constant 0 : i32
    %c0_i32_1 = arith.constant 0 : i32
    return %arg0, %c0_i32, %c0_i32_0 : i32, i32, i32
  }
}

</mosaic_0001>

<bundles_post_ra>
// kernel: tpu_custom_call.1
= control target key start
LH: loop header
LB: loop body
LE: loop exit
PB: predicated region body
PF: predicated region fallthrough
CT: control target
= control target key end

     0   :  { %8 = vsyncpa [#allocation5], 0  ;;  %s1197_s0 = inlined_call_operand.hbm [shape: f32[2,64,256], index: 0, kind: input, shape index: {}]   ;;  %s1198_s1 = inlined_call_operand.vmem [shape: f32[4,64], index: 1, kind: input, shape index: {}]   ;;  %s1199_s2 = inlined_call_operand.vmem [shape: f32[64,4], index: 2, kind: input, shape index: {}]   ;;  %s1200_s3 = inlined_call_operand.vmem [shape: f32[2,64,1], index: 3, kind: output, shape index: {}]  }
   0x1   :  { %10 = vsyncpa [#allocation5 + $0x1], 0  ;;  %s967_s12 = smov 0   ;;  %s969_s13 = smov 0  }
   0x2   :  { %s971_s14 = smov 0   ;;  %s973_s15 = smov 0  }
   0x3   :  { %s975_s16 = smov 0   ;;  %s977_s17 = smov 0  }
   0x4 LB: > { %s735_s18 = sadd.s32 4294967295, %s941_s17   ;;  %s28_s19 = sadd.s32 1, %s937_s16  ;;  %s941_s17 = sphi %s977_s17, %s16_s17   ;;  %s937_s16 = sphi %s975_s16, %s1209_s16   ;;  %s933_s15 = sphi %s973_s15, %s1208_s15   ;;  %s929_s14 = sphi %s971_s14, %s1207_s14   ;;  %s925_s13 = sphi %s969_s13, %s1206_s13   ;;  %s921_s12 = sphi %s967_s12, %s1205_s12  }
   0x5   : > { %p30_p0 = scmp.ge.s32.totalorder %s28_s19, 2  ;;  %s37_s20 = sadd.s32 1, %s929_s14 }
   0x6   : > { %p44_p1 = scmp.ne.s32.totalorder %s929_s14, %s925_s13  ;;  %p45_p2 = scmp.eq.s32.totalorder %s941_s17, 0 }
   0x7   : > { %s1211_s19 = smov (%p30_p0, %s28_s19), 0  ;;  %p50_p4 = scmp.ne.s32.totalorder %s925_s13, %s921_s12 }
   0x8   : > { %p1003_p3 = por %p45_p2, %p44_p1  ;;  %s32_s22 = ssub.s32 %s937_s16, %s1211_s19 }
   0x9   : > { %p51_p5 = scmp.eq.s32.totalorder %s735_s18, 0  ;;  %p35_p6 = scmp.eq.s32.totalorder %s32_s22, 0 }
   0xa   : > { %p776_p8 = scmp.lt.s32.totalorder %s941_s17, 2  ;;  %s148_s25 = sand.u32 1, %s929_s14  }
   0xb   : > { %p1010_p7 = por %p51_p5, %p50_p4  ;;  %s767_s26 = sshll.u32 %s937_s16, 7 }
   0xc   : > { %s1016_s24 = scalar_select %p35_p6, %s929_s14, %s37_s20  }
   0xd   : > { %s739_s27 = sshll.u32 %s148_s25, 7  ;;  %s159_s30 = scalar_lea.hbm %s1197_s0, %s767_s26 }
   0xe   : > { %s160_s4 = sshll.u32 %s159_s30, 4  ;;  %s152_s5 = scalar_lea.vmem [#allocation4], %s739_s27  ;;  %s161_s4 = int_to_ptr.hbm [resolvable:$true] %s160_s4 }
   0xf   : > { %s162_s6 = sshll.u32 %s152_s5, 4  ;;  %p773_p9 = pnand %p776_p8, %p1003_p3  ;;  %s163_s6 = int_to_ptr.vmem [resolvable:$true] %s162_s6 }
  0x10   : > { %p742_p10 = scmp.ge.s32.totalorder %s941_s17, 1  ;;  %p170_p11 = scmp.lt.s32.totalorder %s941_s17, 3 }
  0x11   : > { %s149_s7 = scalar_lea.sflag [#allocation5], %s148_s25  ;;  %s943_s8 = smov 256  }
  0x12   : > { %s944_s9 = smov 16   ;;  %p171_p12 = pnand %p742_p10, %p170_p11 }
  0x13   : > { %775 = dma.hbm_to_vmem [thread:$0]  (!%p773_p9), %s161_s4, 2048, %s163_s6, %s149_s7, %s943_s8, %s943_s8, %s944_s9  }
  0x14   : > { %174 = sbr.rel (%p171_p12) target bundleno = 514 (0x202), region = 32  ;;  %s176_s10 = sand.u32 (!%p171_p12), 1, %s925_s13  }
  0x15   : > { %s743_s11 = sshll.u32 (!%p171_p12), %s176_s10, 7  ;;  %s177_s12 = scalar_lea.sflag (!%p171_p12), [#allocation5], %s176_s10 }
  0x16   : > { %s1028_s18 = scalar_lea.vmem (!%p171_p12), [#allocation4], %s743_s11 }
  0x19   : > { %916 = dma.done.wait (%p1010_p7), %s177_s12, 2048  }
  0x1a   : > { %918 = vsyncadd (%p1010_p7), %s177_s12, 4294965248  ;;  %v224_v0 = vld [vmem:[%s1028_s18 + $0x70] sm:$0xff]  ;;  %v225_v1 = vld [vmem:[%s1028_s18 + $0x78] sm:$0xff]  ;;  %vm278_vm0 = vcmask 7168   ;;  %v945_v16 = vmov 0.0   ;;  %v946_v33 = vmov -inf  }
  0x1b   : > { %v222_v2 = vld [vmem:[%s1028_s18 + $0x60] sm:$0xff]  ;;  %v247_v3 = vadd.f32 %v225_v1, %v224_v0  ;;  %v271_v4 = vmax.f32 %v224_v0, %v225_v1  ;;  %v223_v5 = vld [vmem:[%s1028_s18 + $0x68] sm:$0xff]  ;;  %v220_v7 = vld [vmem:[%s1028_s18 + $0x50] sm:$0xff]  ;;  %286 = vst.msk [vmem:[#allocation2 + $0x38] sm:$0xff] %vm278_vm0, %v945_v16  ;;  %vm380_vm1 = vcmask 523264   ;;  %vm452_vm2 = vcmask 1043456  }
  0x1c   : > { %v268_v6 = vmax.f32 %v222_v2, %v223_v5  ;;  %v221_v8 = vld [vmem:[%s1028_s18 + $0x58] sm:$0xff]  ;;  %v218_v9 = vld [vmem:[%s1028_s18 + $0x40] sm:$0xff]  ;;  %v219_v10 = vld [vmem:[%s1028_s18 + $0x48] sm:$0xff]  ;;  %v244_v11 = vadd.f32 %v223_v5, %v222_v2  ;;  %279 = vst.msk [vmem:[#allocation2] sm:$0xff] %vm278_vm0, %v945_v16  ;;  %vm427_vm3 = vcmask 31744   ;;  %p205_p13 = scmp.lt.s32.totalorder %s933_s15, 1 }
  0x1d   : > { %248 = vadd.xlane.f32.xlu0 %v247_v3  ;;  %272 = vmax.xlane.f32.xlu1 %v271_v4  ;;  %v241_v12 = vadd.f32 %v221_v8, %v220_v7  ;;  %v238_v13 = vadd.f32 %v219_v10, %v218_v9  ;;  %v216_v14 = vld [vmem:[%s1028_s18 + $0x30] sm:$0xff]  ;;  %v217_v15 = vld [vmem:[%s1028_s18 + $0x38] sm:$0xff]  ;;  %280 = vst.msk [vmem:[#allocation2 + $0x8] sm:$0xff] %vm278_vm0, %v945_v16  ;;  %v214_v20 = vld [vmem:[%s1028_s18 + $0x20] sm:$0xff] }
  0x1e   : > { %269 = vmax.xlane.f32.xlu2 %v268_v6  ;;  %v265_v17 = vmax.f32 %v220_v7, %v221_v8  ;;  %v235_v18 = vadd.f32 %v217_v15, %v216_v14  ;;  %281 = vst.msk [vmem:[#allocation2 + $0x10] sm:$0xff] %vm278_vm0, %v945_v16  ;;  %v262_v19 = vmax.f32 %v218_v9, %v219_v10  ;;  %v215_v21 = vld [vmem:[%s1028_s18 + $0x28] sm:$0xff]  ;;  %v212_v22 = vld [vmem:[%s1028_s18 + $0x10] sm:$0xff]  ;;  %v213_v23 = vld [vmem:[%s1028_s18 + $0x18] sm:$0xff]  ;;  %s1213_s15 = smov (!%p205_p13, %s933_s15), 1 }
  0x1f   : > { %282 = vst.msk [vmem:[#allocation2 + $0x18] sm:$0xff] %vm278_vm0, %v945_v16  ;;  %v232_v24 = vadd.f32 %v215_v21, %v214_v20  ;;  %v259_v25 = vmax.f32 %v216_v14, %v217_v15  ;;  %v229_v26 = vadd.f32 %v213_v23, %v212_v22  ;;  %v210_v27 = vld [vmem:[%s1028_s18] sm:$0xff]  ;;  %v211_v28 = vld [vmem:[%s1028_s18 + $0x8] sm:$0xff]  ;;  %v256_v29 = vmax.f32 %v214_v20, %v215_v21  ;;  %s768_s12 = sshll.u32 %s1213_s15, 6 }
  0x20   : > { %283 = vst.msk [vmem:[#allocation2 + $0x20] sm:$0xff] %vm278_vm0, %v945_v16  ;;  %v226_v30 = vadd.f32 %v211_v28, %v210_v27  ;;  %v253_v31 = vmax.f32 %v212_v22, %v213_v23  ;;  %v250_v32 = vmax.f32 %v210_v27, %v211_v28  ;;  %s1135_s20 = scalar_lea.vmem %s1200_s3, %s768_s12 }
  0x21   : > { %284 = vst.msk [vmem:[#allocation2 + $0x28] sm:$0xff] %vm278_vm0, %v945_v16 }
  0x22   : > { %285 = vst.msk [vmem:[#allocation2 + $0x30] sm:$0xff] %vm278_vm0, %v945_v16  ;;  %v302_v34 = vld [vmem:[#allocation2 + $0x38] sm:$0xff] }
  0x23   : > { %294 = vst.msk [vmem:[#allocation3 + $0x38] sm:$0xff] %vm278_vm0, %v946_v33  ;;  %v295_v21 = vld [vmem:[#allocation2] sm:$0xff] }
  0x24   : > { %287 = vst.msk [vmem:[#allocation3] sm:$0xff] %vm278_vm0, %v946_v33  ;;  %v296_v9 = vld [vmem:[#allocation2 + $0x8] sm:$0xff] }
  0x25   : > { %245 = vadd.xlane.f32.xlu0 %v244_v11  ;;  %242 = vadd.xlane.f32.xlu1 %v241_v12  ;;  %288 = vst.msk [vmem:[#allocation3 + $0x8] sm:$0xff] %vm278_vm0, %v946_v33  ;;  %v297_v7 = vld [vmem:[#allocation2 + $0x10] sm:$0xff] }
  0x26   : > { %239 = vadd.xlane.f32.xlu2 %v238_v13  ;;  %289 = vst.msk [vmem:[#allocation3 + $0x10] sm:$0xff] %vm278_vm0, %v946_v33  ;;  %v298_v57 = vld [vmem:[#allocation2 + $0x18] sm:$0xff] }
  0x27   : > { %290 = vst.msk [vmem:[#allocation3 + $0x18] sm:$0xff] %vm278_vm0, %v946_v33  ;;  %v299_v45 = vld [vmem:[#allocation2 + $0x20] sm:$0xff] }
  0x28   : > { %291 = vst.msk [vmem:[#allocation3 + $0x20] sm:$0xff] %vm278_vm0, %v946_v33  ;;  %v300_v44 = vld [vmem:[#allocation2 + $0x28] sm:$0xff] }
  0x29   : > { %292 = vst.msk [vmem:[#allocation3 + $0x28] sm:$0xff] %vm278_vm0, %v946_v33  ;;  %v301_v43 = vld [vmem:[#allocation2 + $0x30] sm:$0xff] }
  0x2a   : > { %293 = vst.msk [vmem:[#allocation3 + $0x30] sm:$0xff] %vm278_vm0, %v946_v33  ;;  %v327_v35 = vld [vmem:[#allocation3 + $0x38] sm:$0xff] }
  0x2c   : > { %v321_v22 = vld [vmem:[#allocation3 + $0x8] sm:$0xff] }
  0x2d   : > { %266 = vmax.xlane.f32.xlu0 %v265_v17  ;;  %236 = vadd.xlane.f32.xlu1 %v235_v18  ;;  %v322_v20 = vld [vmem:[#allocation3 + $0x10] sm:$0xff] }
  0x2e   : > { %263 = vmax.xlane.f32.xlu2 %v262_v19  ;;  %v323_v8 = vld [vmem:[#allocation3 + $0x18] sm:$0xff] }
  0x2f   : > { %v324_v58 = vld [vmem:[#allocation3 + $0x20] sm:$0xff] }
  0x30   : > { %v325_v56 = vld [vmem:[#allocation3 + $0x28] sm:$0xff] }
  0x31   : > { %v326_v36 = vld [vmem:[#allocation3 + $0x30] sm:$0xff] }
  0x35   : > { %233 = vadd.xlane.f32.xlu0 %v232_v24  ;;  %260 = vmax.xlane.f32.xlu1 %v259_v25 }
  0x36   : > { %230 = vadd.xlane.f32.xlu2 %v229_v26 }
  0x3d   : > { %257 = vmax.xlane.f32.xlu0 %v256_v29  ;;  %227 = vadd.xlane.f32.xlu1 %v226_v30 }
  0x3e   : > { %254 = vmax.xlane.f32.xlu2 %v253_v31 }
  0x45   : > { %251 = vmax.xlane.f32.xlu0 %v250_v32 }
  0x90   : > { %v249_v37 = vpop.xlane.xlu0 %248  ;;  %v273_v38 = vpop.xlane.xlu1 %272 }
  0x91   : > { %v310_v39 = vadd.f32 %v302_v34, %v249_v37  ;;  %v335_v40 = vmax.f32 %v327_v35, %v273_v38  ;;  %v270_v41 = vpop.xlane.xlu2 %269  ;;  %v320_v34 = vld [vmem:[#allocation3] sm:$0xff] }
  0x92   : > { %v334_v42 = vmax.f32 %v326_v36, %v270_v41  ;;  %v371_v41 = vld [vmem:[%s1198_s1] sm:$0xf] }
  0x93   : > { %319 = vst.msk [vmem:[#allocation2 + $0x38] sm:$0xff] %vm278_vm0, %v310_v39 }
  0x94   : > { %343 = vst.msk [vmem:[#allocation3 + $0x38] sm:$0xff] %vm278_vm0, %v335_v40 }
  0x95   : > { %342 = vst.msk [vmem:[#allocation3 + $0x30] sm:$0xff] %vm278_vm0, %v334_v42 }
  0x98   : > { %v246_v46 = vpop.xlane.xlu0 %245  ;;  %v243_v47 = vpop.xlane.xlu1 %242 }
  0x99   : > { %v309_v48 = vadd.f32 %v301_v43, %v246_v46  ;;  %v308_v49 = vadd.f32 %v300_v44, %v243_v47  ;;  %v240_v50 = vpop.xlane.xlu2 %239 }
  0x9a   : > { %v354_v51 = vld [vmem:[#allocation2 + $0x38] sm:$0xff]  ;;  %v307_v52 = vadd.f32 %v299_v45, %v240_v50  ;;  %v373_v50 = vld [vmem:[%s1199_s2 + $0x8] sm:$0xff] }
  0x9b   : > { %318 = vst.msk [vmem:[#allocation2 + $0x30] sm:$0xff] %vm278_vm0, %v309_v48  ;;  %v362_v53 = vmul.f32 0.00390625, %v354_v51  ;;  %v370_v54 = vld [vmem:[#allocation3 + $0x38] sm:$0xff]  ;;  %v372_v48 = vld [vmem:[%s1199_s2] sm:$0xff]  ;;  %v377_v51 = vld [vmem:[%s1199_s2 + $0x28] sm:$0xff] }
  0x9c   : > { %317 = vst.msk [vmem:[#allocation2 + $0x28] sm:$0xff] %vm278_vm0, %v308_v49  ;;  %413 = vmatpush.msra.mxu1 %v370_v54  ;;  %v369_v55 = vld [vmem:[#allocation3 + $0x30] sm:$0xff]  ;;  %v376_v49 = vld [vmem:[%s1199_s2 + $0x20] sm:$0xff]  ;;  %v375_v54 = vld [vmem:[%s1199_s2 + $0x18] sm:$0xff] }
  0x9d   : > { %392 = vmatpush.msra.mxu0 %v362_v53  ;;  %316 = vst.msk [vmem:[#allocation2 + $0x20] sm:$0xff] %vm278_vm0, %v307_v52  ;;  %v374_v52 = vld [vmem:[%s1199_s2 + $0x10] sm:$0xff] }
  0x9e   : > { %414 = vmatpush.msra.mxu1 %v369_v55  ;;  %v378_v53 = vld [vmem:[%s1199_s2 + $0x30] sm:$0xff]  ;;  %v379_v55 = vld [vmem:[%s1199_s2 + $0x38] sm:$0xff] }
  0xa0   : > { %v267_v59 = vpop.xlane.xlu0 %266  ;;  %v237_v60 = vpop.xlane.xlu1 %236 }
  0xa1   : > { %v333_v61 = vmax.f32 %v325_v56, %v267_v59  ;;  %v264_v62 = vpop.xlane.xlu2 %263  ;;  %v306_v63 = vadd.f32 %v298_v57, %v237_v60 }
  0xa2   : > { %v353_v0 = vld [vmem:[#allocation2 + $0x30] sm:$0xff]  ;;  %v332_v1 = vmax.f32 %v324_v58, %v264_v62 }
  0xa3   : > { %341 = vst.msk [vmem:[#allocation3 + $0x28] sm:$0xff] %vm278_vm0, %v333_v61  ;;  %v361_v2 = vmul.f32 0.00390625, %v353_v0  ;;  %v352_v3 = vld [vmem:[#allocation2 + $0x28] sm:$0xff] }
  0xa4   : > { %340 = vst.msk [vmem:[#allocation3 + $0x20] sm:$0xff] %vm278_vm0, %v332_v1  ;;  %v360_v4 = vmul.f32 0.00390625, %v352_v3  ;;  %v351_v5 = vld [vmem:[#allocation2 + $0x20] sm:$0xff] }
  0xa5   : > { %393 = vmatpush.msra.mxu0 %v361_v2  ;;  %315 = vst.msk [vmem:[#allocation2 + $0x18] sm:$0xff] %vm278_vm0, %v306_v63  ;;  %v359_v6 = vmul.f32 0.00390625, %v351_v5 }
  0xa7   : > { %394 = vmatpush.msra.mxu0 %v360_v4 }
  0xa8   : > { %v234_v10 = vpop.xlane.xlu0 %233  ;;  %v261_v11 = vpop.xlane.xlu1 %260 }
  0xa9   : > { %v305_v12 = vadd.f32 %v297_v7, %v234_v10  ;;  %395 = vmatpush.msra.mxu0 %v359_v6  ;;  %v331_v13 = vmax.f32 %v323_v8, %v261_v11  ;;  %v231_v14 = vpop.xlane.xlu2 %230 }
  0xaa   : > { %v368_v15 = vld [vmem:[#allocation3 + $0x28] sm:$0xff]  ;;  %v304_v16 = vadd.f32 %v296_v9, %v231_v14 }
  0xab   : > { %314 = vst.msk [vmem:[#allocation2 + $0x10] sm:$0xff] %vm278_vm0, %v305_v12  ;;  %415 = vmatpush.msra.mxu1 %v368_v15  ;;  %v367_v17 = vld [vmem:[#allocation3 + $0x20] sm:$0xff] }
  0xac   : > { %339 = vst.msk [vmem:[#allocation3 + $0x18] sm:$0xff] %vm278_vm0, %v331_v13  ;;  %v350_v18 = vld [vmem:[#allocation2 + $0x18] sm:$0xff] }
  0xad   : > { %313 = vst.msk [vmem:[#allocation2 + $0x8] sm:$0xff] %vm278_vm0, %v304_v16  ;;  %416 = vmatpush.msra.mxu1 %v367_v17  ;;  %v358_v19 = vmul.f32 0.00390625, %v350_v18 }
  0xaf   : > { %396 = vmatpush.msra.mxu0 %v358_v19 }
  0xb0   : > { %v258_v23 = vpop.xlane.xlu0 %257  ;;  %v228_v24 = vpop.xlane.xlu1 %227 }
  0xb1   : > { %v330_v25 = vmax.f32 %v322_v20, %v258_v23  ;;  %v255_v26 = vpop.xlane.xlu2 %254  ;;  %v303_v27 = vadd.f32 %v295_v21, %v228_v24 }
  0xb2   : > { %v349_v28 = vld [vmem:[#allocation2 + $0x10] sm:$0xff]  ;;  %v329_v29 = vmax.f32 %v321_v22, %v255_v26 }
  0xb3   : > { %338 = vst.msk [vmem:[#allocation3 + $0x10] sm:$0xff] %vm278_vm0, %v330_v25  ;;  %v357_v30 = vmul.f32 0.00390625, %v349_v28  ;;  %v366_v31 = vld [vmem:[#allocation3 + $0x18] sm:$0xff] }
  0xb4   : > { %337 = vst.msk [vmem:[#allocation3 + $0x8] sm:$0xff] %vm278_vm0, %v329_v29  ;;  %417 = vmatpush.msra.mxu1 %v366_v31  ;;  %v348_v32 = vld [vmem:[#allocation2 + $0x8] sm:$0xff] }
  0xb5   : > { %397 = vmatpush.msra.mxu0 %v357_v30  ;;  %312 = vst.msk [vmem:[#allocation2] sm:$0xff] %vm278_vm0, %v303_v27  ;;  %v356_v33 = vmul.f32 0.00390625, %v348_v32 }
  0xb7   : > { %398 = vmatpush.msra.mxu0 %v356_v33 }
  0xb8   : > { %v252_v35 = vpop.xlane.xlu0 %251 }
  0xb9   : > { %v328_v36 = vmax.f32 %v320_v34, %v252_v35 }
  0xba   : > { %v365_v37 = vld [vmem:[#allocation3 + $0x10] sm:$0xff] }
  0xbb   : > { %336 = vst.msk [vmem:[#allocation3] sm:$0xff] %vm278_vm0, %v328_v36  ;;  %418 = vmatpush.msra.mxu1 %v365_v37  ;;  %v364_v38 = vld [vmem:[#allocation3 + $0x8] sm:$0xff] }
  0xbc   : > { %v347_v39 = vld [vmem:[#allocation2] sm:$0xff] }
  0xbd   : > { %419 = vmatpush.msra.mxu1 %v364_v38  ;;  %v355_v40 = vmul.f32 0.00390625, %v347_v39 }
  0xbf   : > { %399 = vmatpush.msra.mxu0 %v355_v40 }
  0xc0   : > { %746 = vmatmul.msk.f32.vlgmr.msra.gmra.mxu0 %vm380_vm1, %v371_v41 }
  0xc2   : > { %v363_v42 = vld [vmem:[#allocation3] sm:$0xff] }
  0xc3   : > { %420 = vmatpush.msra.mxu1 %v363_v42 }
  0xc4   : > { %747 = vmatmul.msk.f32.vlgmr.msra.gmra.mxu1 %vm380_vm1, %v371_v41 }
 0x13d   : > { %v401_v43 = vpop.f32.mrf.mxu0 }
 0x13e   : > { %v404_v44 = vmax.f32 %v401_v43, 0.0 }
 0x141   : > { %v422_v45 = vpop.f32.mrf.mxu1 }
 0x142   : > { %v425_v46 = vmax.f32 %v422_v45, 0.0 }
 0x144   : > { %v426_v47 = vadd.f32 %v425_v46, %v404_v44 }
 0x146   : > { %748 = vmatpush.msk.msra.mxu2 %vm452_vm2, %v426_v47  ;;  %769 = vmatpush.msk.msra.mxu3 %vm452_vm2, %v426_v47 }
 0x147   : > { %749 = vmatmul.msk.f32.vlgmr.msra.gmra.mxu2 %vm427_vm3, %v372_v48  ;;  %753 = vmatmul.msk.f32.vlgmr.msra.gmra.mxu3 %vm427_vm3, %v376_v49 }
 0x14f   : > { %750 = vmatmul.msk.f32.gmra.mxu2 %vm427_vm3, %v373_v50  ;;  %754 = vmatmul.msk.f32.gmra.mxu3 %vm427_vm3, %v377_v51 }
 0x157   : > { %751 = vmatmul.msk.f32.gmra.mxu2 %vm427_vm3, %v374_v52  ;;  %755 = vmatmul.msk.f32.gmra.mxu3 %vm427_vm3, %v378_v53 }
 0x15f   : > { %752 = vmatmul.msk.f32.gmra.mxu2 %vm427_vm3, %v375_v54  ;;  %756 = vmatmul.msk.f32.gmra.mxu3 %vm427_vm3, %v379_v55 }
 0x1ca   : > { %v473_v56 = vpop.f32.mrf.mxu2  ;;  %v485_v57 = vpop.f32.mrf.mxu3 }
 0x1cb   : > { %v757_v58 = vmul.f32 -1.442695, %v473_v56  ;;  %v761_v59 = vmul.f32 -1.442695, %v485_v57 }
 0x1cd   : > { %829 = vpow2.f32 %v757_v58 }
 0x1ce   : > { %831 = vpow2.f32 %v761_v59 }
 0x1d2   : > { %v476_v60 = vpop.f32.mrf.mxu2  ;;  %v488_v61 = vpop.f32.mrf.mxu3 }
 0x1d3   : > { %v830_v62 = vpop.eup %829  ;;  %v758_v63 = vmul.f32 -1.442695, %v476_v60  ;;  %v762_v2 = vmul.f32 -1.442695, %v488_v61 }
 0x1d4   : > { %v832_v0 = vpop.eup %831  ;;  %v521_v1 = vadd.f32 1.0, %v830_v62 }
 0x1d5   : > { %v525_v3 = vadd.f32 1.0, %v832_v0  ;;  %833 = vpow2.f32 %v758_v63 }
 0x1d6   : > { %835 = vrcp.f32 %v521_v1  ;;  %v538_v16 = vand.u32 2147483647, %v521_v1  ;;  %v540_v18 = vand.u32 2147483648, %v521_v1  ;;  %vm534_vm5 = vweird.f32 %v521_v1 }
 0x1d7   : > { %837 = vrcp.f32 %v525_v3  ;;  %v600_v21 = vand.u32 2147483648, %v525_v3  ;;  %v598_v23 = vand.u32 2147483647, %v525_v3  ;;  %vm594_vm8 = vweird.f32 %v525_v3 }
 0x1d8   : > { %839 = vpow2.f32 %v762_v2  ;;  %vm1128_vm7 = vcmp.eq.f32.partialorder %v538_v16, 8.507059e+37  ;;  %v541_v31 = vor.u32 1.1754944e-38, %v540_v18 }
 0x1d9   : > { %v601_v36 = vor.u32 1.1754944e-38, %v600_v21  ;;  %vm599_vm11 = vcmp.eq.f32.partialorder %v598_v23, 8.507059e+37 }
 0x1da   : > { %v479_v4 = vpop.f32.mrf.mxu2  ;;  %v491_v5 = vpop.f32.mrf.mxu3 }
 0x1db   : > { %v834_v6 = vpop.eup %833  ;;  %v759_v7 = vmul.f32 -1.442695, %v479_v4  ;;  %v763_v10 = vmul.f32 -1.442695, %v491_v5 }
 0x1dc   : > { %v836_v8 = vpop.eup %835  ;;  %v1118_v9 = vadd.f32 1.0, %v834_v6 }
 0x1dd   : > { %v838_v11 = vpop.eup %837  ;;  %v530_v12 = vmul.f32 %v836_v8, %v521_v1  ;;  %841 = vpow2.f32 %v759_v7  ;;  %vm535_vm4 = vweird.f32 %v836_v8 }
 0x1de   : > { %v840_v13 = vpop.eup %839  ;;  %v590_v14 = vmul.f32 %v838_v11, %v525_v3  ;;  %843 = vrcp.f32 %v1118_v9  ;;  %vm595_vm6 = vweird.f32 %v838_v11  ;;  %vm536_vm9 = vmor %vm534_vm5, %vm535_vm4  ;;  %v555_v44 = vand.u32 2147483648, %v1118_v9 }
 0x1df   : > { %v531_v15 = vsub.f32 1.0, %v530_v12  ;;  %v1124_v17 = vadd.f32 1.0, %v840_v13  ;;  %845 = vpow2.f32 %v763_v10  ;;  %vm596_vm10 = vmor %vm594_vm8, %vm595_vm6  ;;  %v553_v48 = vand.u32 2147483647, %v1118_v9 }
 0x1e0   : > { %v591_v19 = vsub.f32 1.0, %v590_v14  ;;  %vm549_vm13 = vweird.f32 %v1118_v9  ;;  %v556_v52 = vor.u32 1.1754944e-38, %v555_v44 }
 0x1e1   : > { %v532_v20 = vmul.f32 %v836_v8, %v531_v15  ;;  %847 = vrcp.f32 %v1124_v17  ;;  %v615_v53 = vand.u32 2147483648, %v1124_v17  ;;  %v613_v56 = vand.u32 2147483647, %v1124_v17 }
 0x1e2   : > { %v592_v22 = vmul.f32 %v838_v11, %v591_v19  ;;  %v482_v24 = vpop.f32.mrf.mxu2  ;;  %v494_v25 = vpop.f32.mrf.mxu3  ;;  %vm554_vm1 = vcmp.eq.f32.partialorder %v553_v48, 8.507059e+37  ;;  %vm609_vm2 = vweird.f32 %v1124_v17 }
 0x1e3   : > { %v842_v26 = vpop.eup %841  ;;  %v533_v27 = vadd.f32 %v836_v8, %v532_v20  ;;  %v760_v29 = vmul.f32 -1.442695, %v482_v24  ;;  %v764_v34 = vmul.f32 -1.442695, %v494_v25  ;;  %v616_v63 = vor.u32 1.1754944e-38, %v615_v53 }
 0x1e4   : > { %v844_v30 = vpop.eup %843  ;;  %v593_v32 = vadd.f32 %v838_v11, %v592_v22  ;;  %v1138_v33 = vadd.f32 1.0, %v842_v26  ;;  %vm614_vm4 = vcmp.eq.f32.partialorder %v613_v56, 8.507059e+37 }
 0x1e5   : > { %v537_v35 = vsel %vm536_vm9, %v836_v8, %v533_v27  ;;  %v545_v37 = vmul.f32 %v844_v30, %v1118_v9  ;;  %849 = vpow2.f32 %v760_v29  ;;  %v846_v38 = vpop.eup %845  ;;  %vm550_vm12 = vweird.f32 %v844_v30 }
 0x1e6   : > { %v542_v39 = vsel %vm1128_vm7, %v541_v31, %v537_v35  ;;  %v597_v40 = vsel %vm596_vm10, %v838_v11, %v593_v32  ;;  %851 = vrcp.f32 %v1138_v33  ;;  %v1151_v46 = vadd.f32 1.0, %v846_v38  ;;  %vm551_vm14 = vmor %vm549_vm13, %vm550_vm12 }
 0x1e7   : > { %v848_v41 = vpop.eup %847  ;;  %649 = vst.msk [vmem:[%s1135_s20] sm:$0xff] %vm278_vm0, %v542_v39  ;;  %v602_v42 = vsel %vm599_vm11, %v601_v36, %v597_v40  ;;  %v546_v43 = vsub.f32 1.0, %v545_v37  ;;  %853 = vpow2.f32 %v764_v34  ;;  %v568_v4 = vand.u32 2147483647, %v1138_v33 }
 0x1e8   : > { %653 = vst.msk [vmem:[%s1135_s20 + $0x20] sm:$0xff] %vm278_vm0, %v602_v42  ;;  %v605_v45 = vmul.f32 %v848_v41, %v1124_v17  ;;  %855 = vrcp.f32 %v1151_v46  ;;  %vm610_vm15 = vweird.f32 %v848_v41  ;;  %v570_v5 = vand.u32 2147483648, %v1138_v33 }
 0x1e9   : > { %v547_v47 = vmul.f32 %v844_v30, %v546_v43  ;;  %vm611_vm3 = vmor %vm609_vm2, %vm610_vm15  ;;  %vm564_vm6 = vweird.f32 %v1138_v33  ;;  %vm569_vm8 = vcmp.eq.f32.partialorder %v568_v4, 8.507059e+37  ;;  %v628_v13 = vand.u32 2147483647, %v1151_v46 }
 0x1ea   : > { %v606_v49 = vsub.f32 1.0, %v605_v45  ;;  %v571_v12 = vor.u32 1.1754944e-38, %v570_v5  ;;  %v630_v14 = vand.u32 2147483648, %v1151_v46  ;;  %vm624_vm10 = vweird.f32 %v1151_v46 }
 0x1eb   : > { %v850_v50 = vpop.eup %849  ;;  %v548_v51 = vadd.f32 %v844_v30, %v547_v47  ;;  %vm629_vm12 = vcmp.eq.f32.partialorder %v628_v13, 8.507059e+37 }
 0x1ec   : > { %v852_v54 = vpop.eup %851  ;;  %v607_v55 = vmul.f32 %v848_v41, %v606_v49  ;;  %v524_v57 = vadd.f32 1.0, %v850_v50  ;;  %v631_v22 = vor.u32 1.1754944e-38, %v630_v14 }
 0x1ed   : > { %v552_v58 = vsel %vm551_vm14, %v844_v30, %v548_v51  ;;  %v560_v59 = vmul.f32 %v852_v54, %v1138_v33  ;;  %v854_v60 = vpop.eup %853  ;;  %vm565_vm5 = vweird.f32 %v852_v54 }
 0x1ee   : > { %v557_v61 = vsel %vm554_vm1, %v556_v52, %v552_v58  ;;  %v608_v62 = vadd.f32 %v848_v41, %v607_v55  ;;  %857 = vrcp.f32 %v524_v57  ;;  %v528_v1 = vadd.f32 1.0, %v854_v60  ;;  %v856_v2 = vpop.eup %855  ;;  %vm566_vm7 = vmor %vm564_vm6, %vm565_vm5 }
 0x1ef   : > { %650 = vst.msk [vmem:[%s1135_s20 + $0x8] sm:$0xff] %vm278_vm0, %v557_v61  ;;  %v561_v0 = vsub.f32 1.0, %v560_v59  ;;  %v620_v8 = vmul.f32 %v856_v2, %v1151_v46  ;;  %vm625_vm9 = vweird.f32 %v856_v2  ;;  %v583_v23 = vand.u32 2147483647, %v524_v57 }
 0x1f0   : > { %v612_v3 = vsel %vm611_vm3, %v848_v41, %v608_v62  ;;  %859 = vrcp.f32 %v528_v1  ;;  %vm626_vm11 = vmor %vm624_vm10, %vm625_vm9  ;;  %v585_v24 = vand.u32 2147483648, %v524_v57  ;;  %vm579_vm14 = vweird.f32 %v524_v57 }
 0x1f1   : > { %v617_v6 = vsel %vm614_vm4, %v616_v63, %v612_v3  ;;  %v562_v7 = vmul.f32 %v852_v54, %v561_v0  ;;  %v621_v10 = vsub.f32 1.0, %v620_v8  ;;  %vm584_vm1 = vcmp.eq.f32.partialorder %v583_v23, 8.507059e+37 }
 0x1f2   : > { %654 = vst.msk [vmem:[%s1135_s20 + $0x28] sm:$0xff] %vm278_vm0, %v617_v6  ;;  %v586_v31 = vor.u32 1.1754944e-38, %v585_v24  ;;  %v645_v32 = vand.u32 2147483648, %v528_v1  ;;  %v643_v35 = vand.u32 2147483647, %v528_v1  ;;  %vm639_vm3 = vweird.f32 %v528_v1 }
 0x1f3   : > { %v563_v9 = vadd.f32 %v852_v54, %v562_v7  ;;  %v622_v16 = vmul.f32 %v856_v2, %v621_v10 }
 0x1f4   : > { %v858_v11 = vpop.eup %857  ;;  %v646_v38 = vor.u32 1.1754944e-38, %v645_v32  ;;  %vm644_vm5 = vcmp.eq.f32.partialorder %v643_v35, 8.507059e+37 }
 0x1f5   : > { %v567_v15 = vsel %vm566_vm7, %v852_v54, %v563_v9  ;;  %v575_v17 = vmul.f32 %v858_v11, %v524_v57  ;;  %v623_v19 = vadd.f32 %v856_v2, %v622_v16  ;;  %vm580_vm13 = vweird.f32 %v858_v11 }
 0x1f6   : > { %v572_v18 = vsel %vm569_vm8, %v571_v12, %v567_v15  ;;  %v860_v21 = vpop.eup %859  ;;  %vm581_vm15 = vmor %vm579_vm14, %vm580_vm13 }
 0x1f7   : > { %651 = vst.msk [vmem:[%s1135_s20 + $0x10] sm:$0xff] %vm278_vm0, %v572_v18  ;;  %v576_v20 = vsub.f32 1.0, %v575_v17  ;;  %v627_v25 = vsel %vm626_vm11, %v856_v2, %v623_v19  ;;  %v635_v27 = vmul.f32 %v860_v21, %v528_v1  ;;  %vm640_vm2 = vweird.f32 %v860_v21 }
 0x1f8   : > { %v632_v28 = vsel %vm629_vm12, %v631_v22, %v627_v25  ;;  %vm641_vm4 = vmor %vm639_vm3, %vm640_vm2 }
 0x1f9   : > { %v577_v26 = vmul.f32 %v858_v11, %v576_v20  ;;  %655 = vst.msk [vmem:[%s1135_s20 + $0x30] sm:$0xff] %vm278_vm0, %v632_v28  ;;  %v636_v30 = vsub.f32 1.0, %v635_v27 }
 0x1fb   : > { %v578_v29 = vadd.f32 %v858_v11, %v577_v26  ;;  %v637_v34 = vmul.f32 %v860_v21, %v636_v30 }
 0x1fd   : > { %v582_v33 = vsel %vm581_vm15, %v858_v11, %v578_v29  ;;  %v638_v37 = vadd.f32 %v860_v21, %v637_v34 }
 0x1fe   : > { %v587_v36 = vsel %vm584_vm1, %v586_v31, %v582_v33 }
 0x1ff   : > { %652 = vst.msk [vmem:[%s1135_s20 + $0x18] sm:$0xff] %vm278_vm0, %v587_v36  ;;  %v642_v39 = vsel %vm641_vm4, %v860_v21, %v638_v37 }
 0x200   : > { %v647_v40 = vsel %vm644_vm5, %v646_v38, %v642_v39 }
 0x201   : > { %656 = vst.msk [vmem:[%s1135_s20 + $0x38] sm:$0xff] %vm278_vm0, %v647_v40 }
 0x202 PF: > { %s16_s17 = sadd.s32 1, %s941_s17   ;;  %s1205_s12 = smov %s925_s13 }
 0x203   : > { %p13_p0 = scmp.ge.s32.totalorder %s16_s17, 4   ;;  %s1206_s13 = smov %s929_s14 }
 0x204   : > { %s1207_s14 = smov %s1016_s24  ;;  %s1208_s15 = smov %s937_s16 }
 0x205   : > { %s1209_s16 = smov %s1211_s19  ;;  %15 = sbr.rel (!%p13_p0) target bundleno = 4 (0x4), region = 80 }
 0x20a   :  { %678 = vsyncpa [#allocation5], 1 }
 0x20b   :  { %680 = vsyncpa [#allocation5 + $0x1], 1 }

</bundles_post_ra>
